<compile_context>
chip_gen: v6e
topology: v6e:2x2x1
jax: 0.10.0
libtpu: 0.0.40
codegen_flags: <defaults>
</compile_context>

<pallas_src>
import functools

import jax
import jax.numpy as jnp
from jax.experimental import pallas as pl
from jax.experimental.pallas import tpu as pltpu


def _mha_kernel(q_ref, k_ref, v_ref,
                wq_ref, bq_ref, wk_ref, wv_ref, wo_ref, bo_ref,
                o_ref,
                *, nhead, head_dim):
    # Block shapes:
    #   q_ref:        (Bb, Tq, D)  bf16
    #   k_ref, v_ref: (Bb, Tk, D)  bf16  (full key/value sequence for the tile)
    #   wq/wk/wv/wo:  (D, D)       bf16, pre-transposed to (in, out);
    #                               softmax scale already folded into wq.
    #   bq_ref:       (1, D)       f32   (scale folded)
    #   bo_ref:       (1, D)       f32   (= bo + bv @ Wo^T; bk dropped)
    f32 = jnp.float32
    bf16 = jnp.bfloat16

    Bb, Tq, D = q_ref.shape
    Tk = k_ref.shape[1]
    H, hd = nhead, head_dim

    # Flatten (batch, time) rows so each projection is a single MXU matmul.
    q2 = q_ref[...].reshape(Bb * Tq, D)
    k2 = k_ref[...].reshape(Bb * Tk, D)
    v2 = v_ref[...].reshape(Bb * Tk, D)

    # --- QKV projections (bf16 MXU, f32 accumulate) ---
    Q = jnp.dot(q2, wq_ref[...], preferred_element_type=f32) + bq_ref[...]
    K = jnp.dot(k2, wk_ref[...], preferred_element_type=f32)   # bk dropped (softmax invariant)
    V = jnp.dot(v2, wv_ref[...], preferred_element_type=f32)   # bv folded into bo

    # Head split: cast to bf16 BEFORE the relayout (half the relayout bytes),
    # then (rows, D) -> (Bb, T, H, hd) -> (Bb, H, T, hd) -> merge (Bb*H) into a
    # single batch axis for one batched contraction per matmul.
    Qh = Q.astype(bf16).reshape(Bb, Tq, H, hd).transpose(0, 2, 1, 3).reshape(Bb * H, Tq, hd)
    Kh = K.astype(bf16).reshape(Bb, Tk, H, hd).transpose(0, 2, 1, 3).reshape(Bb * H, Tk, hd)
    Vh = V.astype(bf16).reshape(Bb, Tk, H, hd).transpose(0, 2, 1, 3).reshape(Bb * H, Tk, hd)

    # Scores for all (batch, head) pairs at once; scale is baked into Q.
    S = jnp.einsum('gqd,gkd->gqk', Qh, Kh,
                   preferred_element_type=f32)            # (Bb*H, Tq, Tk) f32

    # Numerically stable softmax along the key axis (f32 math, EUP reciprocal).
    S_max = jnp.max(S, axis=-1, keepdims=True)
    P = jnp.exp(S - S_max)
    P = P * pl.reciprocal(jnp.sum(P, axis=-1, keepdims=True), approx=True)
    # dropout(p=0.1) == identity in eval mode.

    # Attention-weighted values, all (batch, head) pairs at once.
    O = jnp.einsum('gqk,gkd->gqd', P.astype(bf16), Vh,
                   preferred_element_type=f32)            # (Bb*H, Tq, hd) f32

    # Merge heads back (bf16 relayout), then one output-projection matmul.
    O = O.astype(bf16).reshape(Bb, H, Tq, hd).transpose(0, 2, 1, 3).reshape(Bb * Tq, D)
    out = jnp.dot(O, wo_ref[...], preferred_element_type=f32) + bo_ref[...]
    o_ref[...] = out.reshape(Bb, Tq, D).astype(o_ref.dtype)


def custom_multi_head_attention(query, key, value, params, *, nhead,
                                block_b=None, block_t=None):
    """query/key/value: [B, T, d_model] float32.
    params: PyTorch-style Linear weights [out, in] and biases [out]."""
    B, T, D = query.shape
    assert D % nhead == 0, "d_model must be divisible by nhead"
    head_dim = D // nhead
    scale = float(head_dim) ** -0.5

    bf16 = jnp.bfloat16
    f32 = jnp.float32

    # (1) bf16 activations at the pallas_call boundary: halves input DMA bytes.
    q_bf = query.astype(bf16)
    k_bf = key.astype(bf16)
    v_bf = value.astype(bf16)

    # (2) Weight/bias prep done once in the wrapper:
    #     pre-transpose to (in, out), pre-cast to bf16, fold the softmax scale
    #     into Wq/bq, drop bk (softmax invariant), fold bv into bo exactly.
    wq = (params["wq"].T * scale).astype(bf16)
    wk = params["wk"].T.astype(bf16)
    wv = params["wv"].T.astype(bf16)
    wo = params["wo"].T.astype(bf16)
    bq = (params["bq"] * scale).reshape(1, D).astype(f32)
    bo = (params["bo"] + params["bv"] @ params["wo"].T).reshape(1, D).astype(f32)

    # (3) Grid: a single step when the whole problem comfortably fits in VMEM
    #     (per-step pipeline overhead ~0.35 us dominates toy shapes);
    #     otherwise tile (batch, query rows) so both v7x TensorCores get work.
    if block_b is None or block_t is None:
        if B * T <= 2048 and T <= 2048:
            block_b, block_t = B, T
        else:
            block_b = 1
            block_t = T
            for cand in (512, 256, 128):
                if T % cand == 0:
                    block_t = cand
                    break
    assert B % block_b == 0 and T % block_t == 0
    grid = (B // block_b, T // block_t)

    q_spec = pl.BlockSpec((block_b, block_t, D), lambda b, t: (b, t, 0))
    kv_spec = pl.BlockSpec((block_b, T, D), lambda b, t: (b, 0, 0))
    out_spec = pl.BlockSpec((block_b, block_t, D), lambda b, t: (b, t, 0))
    # Grid-invariant weights/biases (constant index_map). At production D,
    # add pipeline_mode=pl.Buffered(1) here to avoid dead double-buffer VMEM
    # on v7x; irrelevant at D=32.
    w_spec = pl.BlockSpec((D, D), lambda b, t: (0, 0))
    b_spec = pl.BlockSpec((1, D), lambda b, t: (0, 0))

    kernel = functools.partial(_mha_kernel, nhead=nhead, head_dim=head_dim)

    return pl.pallas_call(
        kernel,
        out_shape=jax.ShapeDtypeStruct((B, T, D), query.dtype),
        grid_spec=pltpu.PrefetchScalarGridSpec(
            num_scalar_prefetch=0,
            grid=grid,
            in_specs=[q_spec, kv_spec, kv_spec,
                      w_spec, b_spec,   # wq, bq(scaled)
                      w_spec,           # wk  (bk dropped)
                      w_spec,           # wv  (bv folded into bo)
                      w_spec, b_spec],  # wo, bo_eff
            out_specs=out_spec,
        ),
        compiler_params=pltpu.CompilerParams(
            dimension_semantics=("parallel", "parallel")),
    )(q_bf, k_bf, v_bf, wq, bq, wk, wv, wo, bo)


def _reference(query, key, value, params, *, nhead):
    """Pure-JAX f32 reference mirroring the PyTorch forward (eval mode)."""
    B, T, D = query.shape
    hd = D // nhead
    scale = float(hd) ** -0.5

    def lin(x, w, b):
        return jnp.einsum("btd,od->bto", x, w) + b

    Q = lin(query, params["wq"], params["bq"])
    K = lin(key, params["wk"], params["bk"])
    V = lin(value, params["wv"], params["bv"])
    Q = Q.reshape(B, T, nhead, hd).transpose(0, 2, 1, 3)
    K = K.reshape(B, T, nhead, hd).transpose(0, 2, 1, 3)
    V = V.reshape(B, T, nhead, hd).transpose(0, 2, 1, 3)
    S = jnp.einsum("bhqd,bhkd->bhqk", Q, K) * scale
    P = jax.nn.softmax(S, axis=-1)
    O = jnp.einsum("bhqk,bhkd->bhqd", P, V)
    O = O.transpose(0, 2, 1, 3).reshape(B, T, D)
    return lin(O, params["wo"], params["bo"])


if __name__ == "__main__":
    B, T, D, NHEAD = 2, 8, 32, 4

    root = jax.random.PRNGKey(0)
    keys = jax.random.split(root, 12)

    # Deterministic synthetic parameters (PyTorch Linear layout: [out, in]).
    params = {
        "wq": 0.05 * jax.random.normal(keys[0], (D, D), jnp.float32),
        "bq": 0.01 * jax.random.normal(keys[1], (D,), jnp.float32),
        "wk": 0.05 * jax.random.normal(keys[2], (D, D), jnp.float32),
        "bk": 0.01 * jax.random.normal(keys[3], (D,), jnp.float32),
        "wv": 0.05 * jax.random.normal(keys[4], (D, D), jnp.float32),
        "bv": 0.01 * jax.random.normal(keys[5], (D,), jnp.float32),
        "wo": 0.05 * jax.random.normal(keys[6], (D, D), jnp.float32),
        "bo": 0.01 * jax.random.normal(keys[7], (D,), jnp.float32),
    }

    query = jax.random.normal(keys[8], (B, T, D), jnp.float32)
    key_in = jax.random.normal(keys[9], (B, T, D), jnp.float32)
    value = jax.random.normal(keys[10], (B, T, D), jnp.float32)

    out = custom_multi_head_attention(query, key_in, value, params, nhead=NHEAD)
    out = jax.block_until_ready(out)

    ref = _reference(query, key_in, value, params, nhead=NHEAD)
    assert out.shape == (B, T, D)
    # bf16 matmul operands / bf16 inputs (f32 accumulation) + approx-reciprocal
    # softmax denominator -> tolerance loosened vs the pure-f32 reference.
    assert jnp.allclose(out, ref, atol=1e-2, rtol=1e-2), "mismatch vs reference"

    print("KERNEL_OK")
</pallas_src>

<mosaic_0001>
module attributes {stable_mosaic.version = 11 : i64} {
  func.func @_mha_kernel(%arg0: i32, %arg1: i32, %arg2: memref<2x8x32xbf16, #tpu.memory_space<vmem>>, %arg3: memref<2x8x32xbf16, #tpu.memory_space<vmem>>, %arg4: memref<2x8x32xbf16, #tpu.memory_space<vmem>>, %arg5: memref<32x32xbf16, #tpu.memory_space<vmem>>, %arg6: memref<1x32xf32, #tpu.memory_space<vmem>>, %arg7: memref<32x32xbf16, #tpu.memory_space<vmem>>, %arg8: memref<32x32xbf16, #tpu.memory_space<vmem>>, %arg9: memref<32x32xbf16, #tpu.memory_space<vmem>>, %arg10: memref<1x32xf32, #tpu.memory_space<vmem>>, %arg11: memref<2x8x32xf32, #tpu.memory_space<vmem>>) attributes {dimension_semantics = [#tpu.dimension_semantics<parallel>, #tpu.dimension_semantics<parallel>], iteration_bounds = array<i64: 1, 1>, scalar_prefetch = 0 : i64, scratch_operands = 0 : i64, tpu.core_type = #tpu.core_type<tc>, window_params = [{transform_indices = @transform_0, window_bounds = array<i64: 2, 8, 32>}, {transform_indices = @transform_1, window_bounds = array<i64: 2, 8, 32>}, {transform_indices = @transform_2, window_bounds = array<i64: 2, 8, 32>}, {pipeline_mode = #tpu.pipeline_mode<synchronous>, transform_indices = @transform_3, window_bounds = array<i64: 32, 32>}, {pipeline_mode = #tpu.pipeline_mode<synchronous>, transform_indices = @transform_4, window_bounds = array<i64: 1, 32>}, {pipeline_mode = #tpu.pipeline_mode<synchronous>, transform_indices = @transform_5, window_bounds = array<i64: 32, 32>}, {pipeline_mode = #tpu.pipeline_mode<synchronous>, transform_indices = @transform_6, window_bounds = array<i64: 32, 32>}, {pipeline_mode = #tpu.pipeline_mode<synchronous>, transform_indices = @transform_7, window_bounds = array<i64: 32, 32>}, {pipeline_mode = #tpu.pipeline_mode<synchronous>, transform_indices = @transform_8, window_bounds = array<i64: 1, 32>}, {transform_indices = @transform_9, window_bounds = array<i64: 2, 8, 32>}]} {
    %c0 = arith.constant 0 : index
    %c0_0 = arith.constant 0 : index
    %c0_1 = arith.constant 0 : index
    %0 = vector.load %arg2[%c0, %c0_0, %c0_1] : memref<2x8x32xbf16, #tpu.memory_space<vmem>>, vector<2x8x32xbf16>
    %1 = vector.shape_cast %0 : vector<2x8x32xbf16> to vector<16x32xbf16>
    %c0_2 = arith.constant 0 : index
    %c0_3 = arith.constant 0 : index
    %c0_4 = arith.constant 0 : index
    %2 = vector.load %arg3[%c0_2, %c0_3, %c0_4] : memref<2x8x32xbf16, #tpu.memory_space<vmem>>, vector<2x8x32xbf16>
    %3 = vector.shape_cast %2 : vector<2x8x32xbf16> to vector<16x32xbf16>
    %c0_5 = arith.constant 0 : index
    %c0_6 = arith.constant 0 : index
    %c0_7 = arith.constant 0 : index
    %4 = vector.load %arg4[%c0_5, %c0_6, %c0_7] : memref<2x8x32xbf16, #tpu.memory_space<vmem>>, vector<2x8x32xbf16>
    %5 = vector.shape_cast %4 : vector<2x8x32xbf16> to vector<16x32xbf16>
    %c0_8 = arith.constant 0 : index
    %c0_9 = arith.constant 0 : index
    %6 = vector.load %arg5[%c0_8, %c0_9] : memref<32x32xbf16, #tpu.memory_space<vmem>>, vector<32x32xbf16>
    %cst = arith.constant dense<0.000000e+00> : vector<16x32xf32>
    %7 = tpu.matmul %1, %6, %cst {dimension_numbers = #tpu.dot_dimension_numbers<[1], [0], [0], [1], [0, 0, 1, 1], [], []>} : vector<16x32xbf16>, vector<32x32xbf16>, vector<16x32xf32> -> vector<16x32xf32>
    %c0_10 = arith.constant 0 : index
    %c0_11 = arith.constant 0 : index
    %8 = vector.load %arg6[%c0_10, %c0_11] : memref<1x32xf32, #tpu.memory_space<vmem>>, vector<1x32xf32>
    %9 = vector.broadcast %8 : vector<1x32xf32> to vector<16x32xf32>
    %10 = arith.addf %7, %9 : vector<16x32xf32>
    %c0_12 = arith.constant 0 : index
    %c0_13 = arith.constant 0 : index
    %11 = vector.load %arg7[%c0_12, %c0_13] : memref<32x32xbf16, #tpu.memory_space<vmem>>, vector<32x32xbf16>
    %cst_14 = arith.constant dense<0.000000e+00> : vector<16x32xf32>
    %12 = tpu.matmul %3, %11, %cst_14 {dimension_numbers = #tpu.dot_dimension_numbers<[1], [0], [0], [1], [0, 0, 1, 1], [], []>} : vector<16x32xbf16>, vector<32x32xbf16>, vector<16x32xf32> -> vector<16x32xf32>
    %c0_15 = arith.constant 0 : index
    %c0_16 = arith.constant 0 : index
    %13 = vector.load %arg8[%c0_15, %c0_16] : memref<32x32xbf16, #tpu.memory_space<vmem>>, vector<32x32xbf16>
    %cst_17 = arith.constant dense<0.000000e+00> : vector<16x32xf32>
    %14 = tpu.matmul %5, %13, %cst_17 {dimension_numbers = #tpu.dot_dimension_numbers<[1], [0], [0], [1], [0, 0, 1, 1], [], []>} : vector<16x32xbf16>, vector<32x32xbf16>, vector<16x32xf32> -> vector<16x32xf32>
    %15 = arith.truncf %10 : vector<16x32xf32> to vector<16x32xbf16>
    %16 = vector.shape_cast %15 : vector<16x32xbf16> to vector<2x8x4x8xbf16>
    %17 = tpu.transpose %16, [0, 2, 1, 3] : vector<2x8x4x8xbf16> -> vector<2x4x8x8xbf16>
    %18 = vector.shape_cast %17 : vector<2x4x8x8xbf16> to vector<8x8x8xbf16>
    %19 = arith.truncf %12 : vector<16x32xf32> to vector<16x32xbf16>
    %20 = vector.shape_cast %19 : vector<16x32xbf16> to vector<2x8x4x8xbf16>
    %21 = tpu.transpose %20, [0, 2, 1, 3] : vector<2x8x4x8xbf16> -> vector<2x4x8x8xbf16>
    %22 = vector.shape_cast %21 : vector<2x4x8x8xbf16> to vector<8x8x8xbf16>
    %23 = arith.truncf %14 : vector<16x32xf32> to vector<16x32xbf16>
    %24 = vector.shape_cast %23 : vector<16x32xbf16> to vector<2x8x4x8xbf16>
    %25 = tpu.transpose %24, [0, 2, 1, 3] : vector<2x8x4x8xbf16> -> vector<2x4x8x8xbf16>
    %26 = vector.shape_cast %25 : vector<2x4x8x8xbf16> to vector<8x8x8xbf16>
    "tpu.trace_start"() <{level = 10 : i32, message = "gqd,gkd->gqk"}> : () -> ()
    %cst_18 = arith.constant dense<0.000000e+00> : vector<8x8x8xf32>
    %27 = tpu.matmul %18, %22, %cst_18 {dimension_numbers = #tpu.dot_dimension_numbers<[2], [2], [1], [1], [0, 0, 0, 1, 1, 1], [0], [0]>} : vector<8x8x8xbf16>, vector<8x8x8xbf16>, vector<8x8x8xf32> -> vector<8x8x8xf32>
    "tpu.trace_stop"() : () -> ()
    %cst_19 = arith.constant dense<0xFF800000> : vector<8x8xf32>
    %28 = vector.multi_reduction <maximumf>, %27, %cst_19 [2] : vector<8x8x8xf32> to vector<8x8xf32>
    %29 = vector.shape_cast %28 : vector<8x8xf32> to vector<8x8x1xf32>
    %30 = vector.broadcast %29 : vector<8x8x1xf32> to vector<8x8x8xf32>
    %31 = arith.subf %27, %30 : vector<8x8x8xf32>
    %32 = math.exp %31 : vector<8x8x8xf32>
    %cst_20 = arith.constant dense<0.000000e+00> : vector<8x8xf32>
    %33 = vector.multi_reduction <add>, %32, %cst_20 [2] : vector<8x8x8xf32> to vector<8x8xf32>
    %34 = vector.shape_cast %33 : vector<8x8xf32> to vector<8x8x1xf32>
    %35 = tpu.reciprocal %34 {approx = true} : vector<8x8x1xf32> -> vector<8x8x1xf32>
    %36 = vector.broadcast %35 : vector<8x8x1xf32> to vector<8x8x8xf32>
    %37 = arith.mulf %32, %36 : vector<8x8x8xf32>
    %38 = arith.truncf %37 : vector<8x8x8xf32> to vector<8x8x8xbf16>
    "tpu.trace_start"() <{level = 10 : i32, message = "gqk,gkd->gqd"}> : () -> ()
    %cst_21 = arith.constant dense<0.000000e+00> : vector<8x8x8xf32>
    %39 = tpu.matmul %38, %26, %cst_21 {dimension_numbers = #tpu.dot_dimension_numbers<[2], [1], [1], [2], [0, 0, 0, 1, 1, 2], [0], [0]>} : vector<8x8x8xbf16>, vector<8x8x8xbf16>, vector<8x8x8xf32> -> vector<8x8x8xf32>
    "tpu.trace_stop"() : () -> ()
    %40 = arith.truncf %39 : vector<8x8x8xf32> to vector<8x8x8xbf16>
    %41 = vector.shape_cast %40 : vector<8x8x8xbf16> to vector<2x4x8x8xbf16>
    %42 = tpu.transpose %41, [0, 2, 1, 3] : vector<2x4x8x8xbf16> -> vector<2x8x4x8xbf16>
    %43 = vector.shape_cast %42 : vector<2x8x4x8xbf16> to vector<16x32xbf16>
    %c0_22 = arith.constant 0 : index
    %c0_23 = arith.constant 0 : index
    %44 = vector.load %arg9[%c0_22, %c0_23] : memref<32x32xbf16, #tpu.memory_space<vmem>>, vector<32x32xbf16>
    %cst_24 = arith.constant dense<0.000000e+00> : vector<16x32xf32>
    %45 = tpu.matmul %43, %44, %cst_24 {dimension_numbers = #tpu.dot_dimension_numbers<[1], [0], [0], [1], [0, 0, 1, 1], [], []>} : vector<16x32xbf16>, vector<32x32xbf16>, vector<16x32xf32> -> vector<16x32xf32>
    %c0_25 = arith.constant 0 : index
    %c0_26 = arith.constant 0 : index
    %46 = vector.load %arg10[%c0_25, %c0_26] : memref<1x32xf32, #tpu.memory_space<vmem>>, vector<1x32xf32>
    %47 = vector.broadcast %46 : vector<1x32xf32> to vector<16x32xf32>
    %48 = arith.addf %45, %47 : vector<16x32xf32>
    %49 = vector.shape_cast %48 : vector<16x32xf32> to vector<2x8x32xf32>
    %c0_27 = arith.constant 0 : index
    %c0_28 = arith.constant 0 : index
    %c0_29 = arith.constant 0 : index
    %50 = vector.load %arg11[%c0_27, %c0_28, %c0_29] : memref<2x8x32xf32, #tpu.memory_space<vmem>>, vector<2x8x32xf32>
    tpu.vector_store %arg11[%c0_27, %c0_28, %c0_29], %49 {strides = array<i32>} : memref<2x8x32xf32, #tpu.memory_space<vmem>>, vector<2x8x32xf32>,
    return
  }
  func.func @transform_0(%arg0: i32, %arg1: i32) -> (i32, i32, i32) {
    %c0_i32 = arith.constant 0 : i32
    %c0_i32_0 = arith.constant 0 : i32
    return %arg0, %arg1, %c0_i32 : i32, i32, i32
  }
  func.func @transform_1(%arg0: i32, %arg1: i32) -> (i32, i32, i32) {
    %c0_i32 = arith.constant 0 : i32
    %c0_i32_0 = arith.constant 0 : i32
    %c0_i32_1 = arith.constant 0 : i32
    return %arg0, %c0_i32, %c0_i32_0 : i32, i32, i32
  }
  func.func @transform_2(%arg0: i32, %arg1: i32) -> (i32, i32, i32) {
    %c0_i32 = arith.constant 0 : i32
    %c0_i32_0 = arith.constant 0 : i32
    %c0_i32_1 = arith.constant 0 : i32
    return %arg0, %c0_i32, %c0_i32_0 : i32, i32, i32
  }
  func.func @transform_3(%arg0: i32, %arg1: i32) -> (i32, i32) {
    %c0_i32 = arith.constant 0 : i32
    %c0_i32_0 = arith.constant 0 : i32
    %c0_i32_1 = arith.constant 0 : i32
    return %c0_i32, %c0_i32_0 : i32, i32
  }
  func.func @transform_4(%arg0: i32, %arg1: i32) -> (i32, i32) {
    %c0_i32 = arith.constant 0 : i32
    %c0_i32_0 = arith.constant 0 : i32
    %c0_i32_1 = arith.constant 0 : i32
    return %c0_i32, %c0_i32_0 : i32, i32
  }
  func.func @transform_5(%arg0: i32, %arg1: i32) -> (i32, i32) {
    %c0_i32 = arith.constant 0 : i32
    %c0_i32_0 = arith.constant 0 : i32
    %c0_i32_1 = arith.constant 0 : i32
    return %c0_i32, %c0_i32_0 : i32, i32
  }
  func.func @transform_6(%arg0: i32, %arg1: i32) -> (i32, i32) {
    %c0_i32 = arith.constant 0 : i32
    %c0_i32_0 = arith.constant 0 : i32
    %c0_i32_1 = arith.constant 0 : i32
    return %c0_i32, %c0_i32_0 : i32, i32
  }
  func.func @transform_7(%arg0: i32, %arg1: i32) -> (i32, i32) {
    %c0_i32 = arith.constant 0 : i32
    %c0_i32_0 = arith.constant 0 : i32
    %c0_i32_1 = arith.constant 0 : i32
    return %c0_i32, %c0_i32_0 : i32, i32
  }
  func.func @transform_8(%arg0: i32, %arg1: i32) -> (i32, i32) {
    %c0_i32 = arith.constant 0 : i32
    %c0_i32_0 = arith.constant 0 : i32
    %c0_i32_1 = arith.constant 0 : i32
    return %c0_i32, %c0_i32_0 : i32, i32
  }
  func.func @transform_9(%arg0: i32, %arg1: i32) -> (i32, i32, i32) {
    %c0_i32 = arith.constant 0 : i32
    %c0_i32_0 = arith.constant 0 : i32
    return %arg0, %arg1, %c0_i32 : i32, i32, i32
  }
}

</mosaic_0001>

<bundles_post_ra>
// kernel: tpu_custom_call.1
= control target key start
LH: loop header
LB: loop body
LE: loop exit
PB: predicated region body
PF: predicated region fallthrough
CT: control target
= control target key end

     0   :  { %14 = vsyncpa [#allocation3], 0  ;;  %s3352_s0 = inlined_call_operand.hbm [shape: bf16[2,8,32], index: 0, kind: input, shape index: {}]   ;;  %s3353_s1 = inlined_call_operand.hbm [shape: bf16[2,8,32], index: 1, kind: input, shape index: {}]   ;;  %s3354_s2 = inlined_call_operand.hbm [shape: bf16[2,8,32], index: 2, kind: input, shape index: {}]   ;;  %s3355_s3 = inlined_call_operand.hbm [shape: bf16[32,32], index: 3, kind: input, shape index: {}]   ;;  %s3356_s4 = inlined_call_operand.vmem [shape: f32[1,32], index: 4, kind: input, shape index: {}]   ;;  %s3357_s5 = inlined_call_operand.hbm [shape: bf16[32,32], index: 5, kind: input, shape index: {}]   ;;  %s3358_s6 = inlined_call_operand.hbm [shape: bf16[32,32], index: 6, kind: input, shape index: {}]   ;;  %s3359_s7 = inlined_call_operand.hbm [shape: bf16[32,32], index: 7, kind: input, shape index: {}]   ;;  %s3360_s8 = inlined_call_operand.vmem [shape: f32[1,32], index: 8, kind: input, shape index: {}]   ;;  %s3361_s9 = inlined_call_operand.hbm [shape: f32[2,8,32], index: 9, kind: output, shape index: {}]  }
   0x1   :  { %15 = vsyncpa [#allocation6], 0 }
   0x2   :  { %16 = vsyncpa [#allocation9], 0 }
   0x3   :  { %17 = vsyncpa [#allocation12], 0 }
   0x4   :  { %18 = vsyncpa [#allocation4], 0  ;;  %s2885_s30 = smov [#allocation5]   ;;  %s2886_s11 = smov [#allocation8]  }
   0x5   :  { %s36_s10 = sshll.u32 %s2885_s30, 4  ;;  %s60_s12 = sshll.u32 %s2886_s11, 4  ;;  %s37_s10 = int_to_ptr.vmem [resolvable:$true] %s36_s10  ;;  %s61_s12 = int_to_ptr.vmem [resolvable:$true] %s60_s12 }
   0x6   :  { %s2723_s13 = scalar_lea.vmem %s37_s10, 128  ;;  %p2728_p1 = scmp.lt.s32.totalorder %s37_s10, %s37_s10 }
   0x7   :  { %p2724_p0 = scmp.ne.s32.totalorder %s37_s10, %s2723_s13  ;;  %p2729_p2 = scmp.lt.s32.totalorder %s2723_s13, %s2723_s13 }
   0x9   :  { %p2730_p3 = por %p2729_p2, %p2728_p1 }
   0xb   :  { %p2731_p4 = pnand %p2730_p3, %p2724_p0 }
   0xd   :  { %2734 = shalt.err (!%p2731_p4)
}
   0xe   :  { %s2887_s14 = smov 64   ;;  %s2888_s15 = smov 4  }
   0xf   :  { %42 = dma.hbm_to_vmem [thread:$0]  %s3353_s1, 128, %s37_s10, [#allocation6], %s2887_s14, %s2887_s14, %s2888_s15  }
  0x10   :  { %s2743_s18 = scalar_lea.vmem %s61_s12, 256  ;;  %p2748_p6 = scmp.lt.s32.totalorder %s61_s12, %s61_s12 }
  0x11   :  { %p2744_p5 = scmp.ne.s32.totalorder %s61_s12, %s2743_s18  ;;  %p2749_p7 = scmp.lt.s32.totalorder %s2743_s18, %s2743_s18 }
  0x13   :  { %p2750_p8 = por %p2749_p7, %p2748_p6 }
  0x15   :  { %p2751_p9 = pnand %p2750_p8, %p2744_p5 }
  0x17   :  { %2754 = shalt.err (!%p2751_p9)
}
  0x18   :  { %66 = dma.hbm_to_vmem [thread:$0]  %s3355_s3, 256, %s61_s12, [#allocation9], %s2887_s14, %s2887_s14, %s2888_s15  }
  0x19   :  { %s2889_s21 = smov [#allocation11]   ;;  %s2890_s23 = smov [#allocation2]  }
  0x1a   :  { %s86_s22 = sshll.u32 %s2889_s21, 4  ;;  %s24_s24 = sshll.u32 %s2890_s23, 4  ;;  %s87_s22 = int_to_ptr.vmem [resolvable:$true] %s86_s22  ;;  %s25_s24 = int_to_ptr.vmem [resolvable:$true] %s24_s24 }
  0x1b   :  { %s2763_s1 = scalar_lea.vmem %s87_s22, 256  ;;  %p2768_p11 = scmp.lt.s32.totalorder %s87_s22, %s87_s22 }
  0x1c   :  { %p2764_p10 = scmp.ne.s32.totalorder %s87_s22, %s2763_s1  ;;  %p2769_p12 = scmp.lt.s32.totalorder %s2763_s1, %s2763_s1 }
  0x1e   :  { %p2770_p13 = por %p2769_p12, %p2768_p11 }
  0x20   :  { %p2771_p0 = pnand %p2770_p13, %p2764_p10 }
  0x22   :  { %2774 = shalt.err (!%p2771_p0)
}
  0x23   :  { %92 = dma.hbm_to_vmem [thread:$0]  %s3358_s6, 256, %s87_s22, [#allocation12], %s2887_s14, %s2887_s14, %s2888_s15  }
  0x24   :  { %s2783_s3 = scalar_lea.vmem %s25_s24, 128  ;;  %p2788_p2 = scmp.lt.s32.totalorder %s25_s24, %s25_s24 }
  0x25   :  { %p2784_p1 = scmp.ne.s32.totalorder %s25_s24, %s2783_s3  ;;  %p2789_p3 = scmp.lt.s32.totalorder %s2783_s3, %s2783_s3 }
  0x27   :  { %p2790_p4 = por %p2789_p3, %p2788_p2 }
  0x29   :  { %p2791_p5 = pnand %p2790_p4, %p2784_p1 }
  0x2b   :  { %2794 = shalt.err (!%p2791_p5)
}
  0x2c   :  { %30 = dma.hbm_to_vmem [thread:$0]  %s3352_s0, 128, %s25_s24, [#allocation3], %s2887_s14, %s2887_s14, %s2888_s15  }
  0x2d   :  { %s2891_s29 = smov [#allocation7]   ;;  %s2892_s10 = smov [#allocation10]  }
  0x2e   :  { %s48_s30 = sshll.u32 %s2891_s29, 4  ;;  %s74_s11 = sshll.u32 %s2892_s10, 4  ;;  %s49_s30 = int_to_ptr.vmem [resolvable:$true] %s48_s30  ;;  %s75_s11 = int_to_ptr.vmem [resolvable:$true] %s74_s11 }
  0x2f   :  { %s2803_s6 = scalar_lea.vmem %s49_s30, 128  ;;  %p2808_p7 = scmp.lt.s32.totalorder %s49_s30, %s49_s30 }
  0x30   :  { %p2804_p6 = scmp.ne.s32.totalorder %s49_s30, %s2803_s6  ;;  %p2809_p8 = scmp.lt.s32.totalorder %s2803_s6, %s2803_s6 }
  0x32   :  { %p2810_p9 = por %p2809_p8, %p2808_p7 }
  0x34   :  { %p2811_p10 = pnand %p2810_p9, %p2804_p6 }
  0x36   :  { %2814 = shalt.err (!%p2811_p10)
}
  0x37   :  { %54 = dma.hbm_to_vmem [thread:$0]  %s3354_s2, 128, %s49_s30, [#allocation6], %s2887_s14, %s2887_s14, %s2888_s15  }
  0x38   :  { %s2823_s0 = scalar_lea.vmem %s75_s11, 256  ;;  %p2828_p12 = scmp.lt.s32.totalorder %s75_s11, %s75_s11 }
  0x39   :  { %p2824_p11 = scmp.ne.s32.totalorder %s75_s11, %s2823_s0  ;;  %p2829_p13 = scmp.lt.s32.totalorder %s2823_s0, %s2823_s0 }
  0x3b   :  { %p2830_p0 = por %p2829_p13, %p2828_p12 }
  0x3d   :  { %p2831_p1 = pnand %p2830_p0, %p2824_p11 }
  0x3f   :  { %2834 = shalt.err (!%p2831_p1)
}
  0x40   :  { %80 = dma.hbm_to_vmem [thread:$0]  %s3357_s5, 256, %s75_s11, [#allocation9], %s2887_s14, %s2887_s14, %s2888_s15  }
  0x41   :  { %s2893_s18 = smov [#allocation13]  }
  0x42   :  { %s98_s19 = sshll.u32 %s2893_s18, 4  ;;  %s99_s19 = int_to_ptr.vmem [resolvable:$true] %s98_s19 }
  0x43   :  { %s2843_s20 = scalar_lea.vmem %s99_s19, 256  ;;  %p2848_p3 = scmp.lt.s32.totalorder %s99_s19, %s99_s19 }
  0x44   :  { %p2844_p2 = scmp.ne.s32.totalorder %s99_s19, %s2843_s20  ;;  %p2849_p4 = scmp.lt.s32.totalorder %s2843_s20, %s2843_s20 }
  0x46   :  { %p2850_p5 = por %p2849_p4, %p2848_p3 }
  0x48   :  { %p2851_p6 = pnand %p2850_p5, %p2844_p2 }
  0x4a   :  { %2854 = shalt.err (!%p2851_p6)
}
  0x4b   :  { %104 = dma.hbm_to_vmem [thread:$0]  %s3359_s7, 256, %s99_s19, [#allocation12], %s2887_s14, %s2887_s14, %s2888_s15  }
  0x4c   :  { %2875 = dma.done.wait [#allocation3], 128  }
  0x4d   :  { %2876 = vsyncadd [#allocation3], 4294967168 }
  0x4e   :  { %2877 = dma.done.wait [#allocation6], 256  }
  0x4f   :  { %2878 = vsyncadd [#allocation6], 4294967040 }
  0x50   :  { %2879 = dma.done.wait [#allocation9], 512  }
  0x51   :  { %2880 = vsyncadd [#allocation9], 4294966784 }
  0x52   :  { %2881 = dma.done.wait [#allocation12], 512  }
  0x53   :  { %2882 = vsyncadd [#allocation12], 4294966784  ;;  %v2894_v0 = vmov 0.0   ;;  %vm2895_vm0 = vmmov 0   ;;  %v2672_v1 = vld [vmem:[#allocation10 + $0x8] sm:$0xff]   ;;  %v2673_v2 = vld [vmem:[#allocation8 + $0x8] sm:$0xff]   ;;  %v372_v25 = vlaneseq }
  0x54   :  { %2530 = vmatprep.subr.bf16.mxu1 %v2894_v0  ;;  %2522 = vmatprep.subr.bf16.mxu0 %v2894_v0  ;;  %v2674_v3 = vld [vmem:[#allocation10] sm:$0xff]   ;;  %v2675_v4 = vld [vmem:[#allocation8] sm:$0xff]   ;;  %vm163_vm1 = vcmask 261120   ;;  %v2677_v6 = vld [vmem:[#allocation2] sm:$0xff]   ;;  %s2896_s14 = smov 104   ;;  %s2897_s15 = smov 120  }
  0x55   :  { %2534 = vmatprep.mubr.msk.bf16.mxu1 %vm2895_vm0, %v2894_v0  ;;  %2526 = vmatprep.mubr.msk.bf16.mxu0 %vm2895_vm0, %v2894_v0  ;;  %v2676_v5 = vld [vmem:[#allocation5] sm:$0xff]   ;;  %v2433_v8 = vld [vmem:[%s3356_s4] ss:$0 sm:$0xff]  ;;  %s2898_s22 = smov 112   ;;  %v2679_v21 = vld [vmem:[#allocation11] sm:$0xff]   ;;  %v373_v29 = vshrl.u32 %v372_v25, 7 }
  0x56   :  { %2531 = vmatpush3.bf16.msra.mxu1 %v2672_v1  ;;  %2523 = vmatpush3.bf16.msra.mxu0 %v2673_v2  ;;  %v2678_v20 = vld [vmem:[#allocation11 + $0x8] sm:$0xff]   ;;  %v2680_v22 = vld [vmem:[#allocation7] sm:$0xff]   ;;  %v2899_v23 = vmov 1983009808   ;;  %v2900_v26 = vmov 1934713408  }
  0x57   :  { %2532 = vmatprep.subr.bf16.mxu1 %v2894_v0  ;;  %2524 = vmatprep.subr.bf16.mxu0 %v2894_v0  ;;  %v370_v24 = vunpack.c.l.s4 %v2899_v23  ;;  %v401_v27 = vunpack.c.l.s4 %v2900_v26  ;;  %v2901_v34 = vmov 0   ;;  %vm1184_vm2 = vcmask 64512   ;;  %s2902_s4 = smov 16   ;;  %s2903_s23 = smov 8  }
  0x58   :  { %v3036_v35 = vpack.i.b16 %v2901_v34, %v2901_v34  ;;  %vm1652_vm3 = vcmask 1043456   ;;  %s2904_s24 = smov 24   ;;  %vm2339_vm4 = vcmask 130048   ;;  %vm2342_vm5 = vcmask 195584   ;;  %s2905_s26 = smov [#allocation14]  }
  0x59   :  { %v371_v28 = vunpack.c.0.s8 %v370_v24  ;;  %v402_v33 = vunpack.c.0.s8 %v401_v27  ;;  %s2418_s3 = sshll.u32 %s2905_s26, 4  ;;  %s2419_s3 = int_to_ptr.vmem [resolvable:$true] %s2418_s3 }
  0x5a   :  { %2533 = vmatpush3.bf16.msra.mxu1 %v2674_v3  ;;  %2525 = vmatpush3.bf16.msra.mxu0 %v2675_v4  ;;  %s2855_s27 = scalar_lea.vmem %s2419_s3, 256  ;;  %p2860_p8 = scmp.lt.s32.totalorder %s2419_s3, %s2419_s3 }
  0x5b   :  { %2546 = vmatprep.subr.bf16.mxu1 %v2894_v0  ;;  %2538 = vmatprep.subr.bf16.mxu0 %v2894_v0  ;;  %v3038_v36 = vsub.s32 %v371_v28, %v373_v29  ;;  %v3040_v43 = vsub.s32 %v402_v33, %v373_v29  ;;  %p2856_p7 = scmp.ne.s32.totalorder %s2419_s3, %s2855_s27  ;;  %p2861_p9 = scmp.lt.s32.totalorder %s2855_s27, %s2855_s27 }
  0x5d   :  { %2535 = vmatmul.mubr.msk.bf16.vlgmr.msra.gmra.mxu1 %vm163_vm1, %v2676_v5  ;;  %2527 = vmatmul.mubr.msk.bf16.vlgmr.msra.gmra.mxu0 %vm163_vm1, %v2677_v6  ;;  %p2862_p10 = por %p2861_p9, %p2860_p8 }
  0x5e   :  { %2548 = vmatprep.mubr.msk.bf16.mxu1 %vm2895_vm0, %v2894_v0  ;;  %2542 = vmatprep.mubr.msk.bf16.mxu0 %vm2895_vm0, %v2894_v0 }
  0x5f   :  { %2539 = vmatpush3.bf16.msra.mxu0 %v2678_v20  ;;  %p2863_p11 = pnand %p2862_p10, %p2856_p7 }
  0x60   :  { %2540 = vmatprep.subr.bf16.mxu0 %v2894_v0 }
  0x63   :  { %2541 = vmatpush3.bf16.msra.mxu0 %v2679_v21 }
  0x64   :  { %2552 = vmatprep.subr.bf16.mxu0 %v2894_v0 }
  0x66   :  { %2543 = vmatmul.mubr.msk.bf16.vlgmr.msra.gmra.mxu0 %vm163_vm1, %v2680_v22 }
  0x67   :  { %2554 = vmatprep.mubr.msk.bf16.mxu0 %vm2895_vm0, %v2894_v0 }
 0x11d   :  { %v266_v7 = vpop.f32.mrf.mxu1  ;;  %v201_v9 = vpop.f32.mrf.mxu0 }
 0x11e   :  { %v202_v12 = vadd.f32 %v2433_v8, %v201_v9 }
 0x11f   :  { %v2536_v10 = vpop.f32.mrf.mxu1  ;;  %v2528_v11 = vpop.f32.mrf.mxu0 }
 0x121   :  { %v269_v13 = vpop.f32.mrf.mxu1  ;;  %v204_v15 = vpop.f32.mrf.mxu0 }
 0x122   :  { %v624_v14 = vpack.c.bf16 %v269_v13, %v266_v7  ;;  %v205_v16 = vadd.f32 %v2433_v8, %v204_v15 }
 0x123   :  { %v2537_v17 = vpop.f32.mrf.mxu1  ;;  %v2529_v18 = vpop.f32.mrf.mxu0 }
 0x124   :  { %630 = vrot.lane.b32.xlu1 %v624_v14, %s2896_s14  ;;  %626 = vrot.lane.b32.xlu0 %v624_v14, %s2897_s15  ;;  %v3020_v19 = vpack.c.bf16 %v205_v16, %v202_v12  ;;  %v636_v38 = vshrl.u32 %v624_v14, 16 }
 0x126   :  { %v350_v6 = vshrl.u32 %v3020_v19, 16 }
 0x128   :  { %628 = vrot.lane.b32.xlu0 %v624_v14, %s2898_s22  ;;  %340 = vrot.lane.b32.xlu1 %v3020_v19, %s2897_s15 }
 0x12c   :  { %342 = vrot.lane.b32.xlu0 %v3020_v19, %s2898_s22  ;;  %344 = vrot.lane.b32.xlu1 %v3020_v19, %s2896_s14 }
 0x196   :  { %v627_v30 = vpop.permute.xlu0 %626  ;;  %v631_v32 = vpop.permute.xlu1 %630 }
 0x197   :  { %v637_v31 = vshrl.u32 %v627_v30, 16  ;;  %v634_v37 = vpack.i.b16 %v627_v30, %v624_v14  ;;  %v645_v42 = vshrl.u32 %v631_v32, 16 }
 0x199   :  { %v638_v40 = vpack.i.b16 %v637_v31, %v636_v38  ;;  %v648_v45 = vcombine.high %v634_v37, %v3036_v35  ;;  %v655_v46 = vrot.slane %v634_v37, %v3038_v36 }
 0x19a   :  { %v629_v39 = vpop.permute.xlu0 %628  ;;  %v341_v50 = vpop.permute.xlu1 %340 }
 0x19b   :  { %v642_v41 = vpack.i.b16 %v631_v32, %v629_v39  ;;  %v644_v44 = vshrl.u32 %v629_v39, 16  ;;  %v714_v51 = vcombine.high %v638_v40, %v3036_v35  ;;  %v721_v54 = vrot.slane %v638_v40, %v3038_v36 }
 0x19c   :  { %v662_v58 = vrot.slane %v648_v45, %v3038_v36  ;;  %v351_v61 = vshrl.u32 %v341_v50, 16  ;;  %v348_v2 = vpack.i.b16 %v341_v50, %v3020_v19 }
 0x19d   :  { %v663_v47 = vcombine.high %v642_v41, %v3036_v35  ;;  %v670_v48 = vrot.slane %v642_v41, %v3038_v36  ;;  %v646_v49 = vpack.i.b16 %v645_v42, %v644_v44  ;;  %v728_v3 = vrot.slane %v714_v51, %v3038_v36 }
 0x19e   :  { %v343_v11 = vpop.permute.xlu0 %342  ;;  %v345_v12 = vpop.permute.xlu1 %344  ;;  %v352_v15 = vpack.i.b16 %v351_v61, %v350_v6  ;;  %v368_v20 = vcombine.high %v348_v2, %v3036_v35  ;;  %v375_v21 = vrot.slane %v348_v2, %v3038_v36 }
 0x19f   :  { %v678_v52 = vcombine.low %v655_v46, %v670_v48  ;;  %v679_v53 = vcombine.high %v655_v46, %v670_v48  ;;  %v677_v55 = vrot.slane %v663_v47, %v3038_v36  ;;  %v729_v56 = vcombine.high %v646_v49, %v3036_v35 }
 0x1a0   :  { %v736_v57 = vrot.slane %v646_v49, %v3038_v36  ;;  %v358_v22 = vshrl.u32 %v343_v11, 16  ;;  %v356_v23 = vpack.i.b16 %v345_v12, %v343_v11  ;;  %v359_v28 = vshrl.u32 %v345_v12, 16 }
 0x1a1   :  { %v686_v59 = vrot.slane %v678_v52, %v3040_v43  ;;  %v693_v60 = vrot.slane %v679_v53, %v3040_v43  ;;  %v743_v62 = vrot.slane %v729_v56, %v3038_v36  ;;  %v694_v7 = vcombine.low %v662_v58, %v677_v55 }
 0x1a2   :  { %v744_v63 = vcombine.low %v721_v54, %v736_v57  ;;  %v745_v1 = vcombine.high %v721_v54, %v736_v57  ;;  %v695_v8 = vcombine.high %v662_v58, %v677_v55  ;;  %v383_v29 = vcombine.high %v356_v23, %v3036_v35 }
 0x1a3   :  { %v780_v4 = vcombine.low %v686_v59, %v693_v60  ;;  %v2450_v5 = vcombine.high %v686_v59, %v693_v60  ;;  %v760_v16 = vcombine.low %v728_v3, %v743_v62  ;;  %v761_v19 = vcombine.high %v728_v3, %v743_v62 }
 0x1a4   :  { %v752_v9 = vrot.slane %v744_v63, %v3040_v43  ;;  %v759_v10 = vrot.slane %v745_v1, %v3040_v43  ;;  %v702_v24 = vrot.slane %v694_v7, %v3040_v43  ;;  %v709_v25 = vrot.slane %v695_v8, %v3040_v43 }
 0x1a5   :  { %v787_v13 = vrot.slane %v780_v4, %v3038_v36  ;;  %v795_v14 = vrot.slane %v2450_v5, %v3038_v36  ;;  %v390_v30 = vrot.slane %v356_v23, %v3038_v36  ;;  %v768_v32 = vrot.slane %v760_v16, %v3040_v43 }
 0x1a6   :  { %v805_v17 = vcombine.low %v752_v9, %v759_v10  ;;  %v2451_v18 = vcombine.high %v752_v9, %v759_v10  ;;  %v382_v33 = vrot.slane %v368_v20, %v3038_v36  ;;  %v434_v37 = vcombine.high %v352_v15, %v3036_v35 }
 0x1a7   :  { %v796_v31 = vcombine.low %v787_v13, %v795_v14  ;;  %v775_v39 = vrot.slane %v761_v19, %v3040_v43  ;;  %v360_v40 = vpack.i.b16 %v359_v28, %v358_v22  ;;  %v398_v41 = vcombine.low %v375_v21, %v390_v30 }
 0x1a8   :  { %v812_v26 = vrot.slane %v805_v17, %v3038_v36  ;;  %v820_v27 = vrot.slane %v2451_v18, %v3038_v36  ;;  %v399_v42 = vcombine.high %v375_v21, %v390_v30  ;;  %v830_v44 = vcombine.low %v702_v24, %v709_v25 }
 0x1a9   :  { %v441_v45 = vrot.slane %v352_v15, %v3038_v36  ;;  %v803_v46 = vrot.slane %v796_v31, %v3040_v43  ;;  %v2452_v48 = vcombine.high %v702_v24, %v709_v25  ;;  %v397_v49 = vrot.slane %v383_v29, %v3038_v36 }
 0x1aa   :  { %v821_v38 = vcombine.low %v812_v26, %v820_v27  ;;  %v406_v50 = vrot.slane %v398_v41, %v3040_v43  ;;  %v413_v51 = vrot.slane %v399_v42, %v3040_v43  ;;  %v448_v52 = vrot.slane %v434_v37, %v3038_v36 }
 0x1ab   :  { %v449_v53 = vcombine.high %v360_v40, %v3036_v35  ;;  %v456_v54 = vrot.slane %v360_v40, %v3038_v36  ;;  %v855_v56 = vcombine.low %v768_v32, %v775_v39  ;;  %v2453_v57 = vcombine.high %v768_v32, %v775_v39 }
 0x1ac   :  { %v828_v47 = vrot.slane %v821_v38, %v3040_v43  ;;  %v500_v58 = vcombine.low %v406_v50, %v413_v51  ;;  %v2446_v59 = vcombine.high %v406_v50, %v413_v51  ;;  %v837_v1 = vrot.slane %v830_v44, %v3038_v36 }
 0x1ad   :  { %v463_v60 = vrot.slane %v449_v53, %v3038_v36  ;;  %v464_v61 = vcombine.low %v441_v45, %v456_v54  ;;  %v465_v62 = vcombine.high %v441_v45, %v456_v54  ;;  %v414_v2 = vcombine.low %v382_v33, %v397_v49 }
 0x1ae   :  { %v882_v55 = vpack.i.b16 %v828_v47, %v803_v46  ;;  %v507_v3 = vrot.slane %v500_v58, %v3038_v36  ;;  %v515_v4 = vrot.slane %v2446_v59, %v3038_v36  ;;  %v415_v9 = vcombine.high %v382_v33, %v397_v49 }
 0x1af   :  { %v472_v5 = vrot.slane %v464_v61, %v3040_v43  ;;  %v479_v6 = vrot.slane %v465_v62, %v3040_v43  ;;  %v480_v7 = vcombine.low %v448_v52, %v463_v60  ;;  %v481_v8 = vcombine.high %v448_v52, %v463_v60 }
 0x1b0   :  { %v1189_v63 = vsel %vm1184_vm2, %v882_v55, 0  ;;  %v516_v10 = vcombine.low %v507_v3, %v515_v4  ;;  %v883_v11 = vshrl.u32 %v803_v46, 16  ;;  %v884_v12 = vshrl.u32 %v828_v47, 16 }
 0x1b1   :  { %2547 = vmatpush3.bf16.xpose.msra.mxu1 %v1189_v63  ;;  %v525_v13 = vcombine.low %v472_v5, %v479_v6  ;;  %v2447_v14 = vcombine.high %v472_v5, %v479_v6  ;;  %v862_v15 = vrot.slane %v855_v56, %v3038_v36  ;;  %v870_v16 = vrot.slane %v2453_v57, %v3038_v36 }
 0x1b2   :  { %2558 = vmatprep.subr.bf16.mxu1 %v2894_v0  ;;  %v845_v17 = vrot.slane %v2452_v48, %v3038_v36  ;;  %v488_v18 = vrot.slane %v480_v7, %v3040_v43  ;;  %v495_v20 = vrot.slane %v481_v8, %v3040_v43  ;;  %v885_v19 = vpack.i.b16 %v884_v12, %v883_v11 }
 0x1b3   :  { %v422_v21 = vrot.slane %v414_v2, %v3040_v43  ;;  %v532_v22 = vrot.slane %v525_v13, %v3038_v36  ;;  %v540_v23 = vrot.slane %v2447_v14, %v3038_v36  ;;  %v804_v24 = vcombine.high %v803_v46, %v2901_v34 }
 0x1b4   :  { %v429_v25 = vrot.slane %v415_v9, %v3040_v43  ;;  %v523_v26 = vrot.slane %v516_v10, %v3040_v43  ;;  %v1235_v27 = vsel %vm1184_vm2, %v885_v19, 0  ;;  %v829_v28 = vcombine.high %v828_v47, %v2901_v34 }
 0x1b5   :  { %v541_v29 = vcombine.low %v532_v22, %v540_v23  ;;  %2553 = vmatpush3.bf16.xpose.msra.mxu0 %v1235_v27  ;;  %v871_v30 = vcombine.low %v862_v15, %v870_v16  ;;  %v575_v31 = vcombine.low %v488_v18, %v495_v20  ;;  %v846_v33 = vcombine.low %v837_v1, %v845_v17 }
 0x1b6   :  { %2564 = vmatprep.subr.bf16.mxu0 %v2894_v0  ;;  %v890_v32 = vshrl.u32 %v829_v28, 16  ;;  %v2449_v37 = vcombine.high %v488_v18, %v495_v20  ;;  %v888_v39 = vpack.i.b16 %v829_v28, %v804_v24  ;;  %v889_v40 = vshrl.u32 %v804_v24, 16  ;;  %v331_v28 = vpop.f32.mrf.mxu0 }
 0x1b7   :  { %v548_v38 = vrot.slane %v541_v29, %v3040_v43  ;;  %v550_v41 = vcombine.low %v422_v21, %v429_v25  ;;  %v2448_v42 = vcombine.high %v422_v21, %v429_v25  ;;  %v603_v44 = vshrl.u32 %v523_v26, 16 }
 0x1b8   :  { %v891_v48 = vpack.i.b16 %v890_v32, %v889_v40  ;;  %v878_v47 = vrot.slane %v871_v30, %v3040_v43  ;;  %v582_v49 = vrot.slane %v575_v31, %v3038_v36  ;;  %v853_v50 = vrot.slane %v846_v33, %v3040_v43  ;;  %v2544_v29 = vpop.f32.mrf.mxu0 }
 0x1b9   :  { %v602_v45 = vpack.i.b16 %v548_v38, %v523_v26  ;;  %v604_v46 = vshrl.u32 %v548_v38, 16  ;;  %v590_v51 = vrot.slane %v2449_v37, %v3038_v36  ;;  %v1281_v52 = vsel %vm1184_vm2, %v888_v39, 0 }
 0x1ba   :  { %v549_v54 = vcombine.high %v548_v38, %v2901_v34  ;;  %v557_v55 = vrot.slane %v550_v41, %v3038_v36  ;;  %v565_v56 = vrot.slane %v2448_v42, %v3038_v36  ;;  %v1327_v57 = vsel %vm1184_vm2, %v891_v48, 0  ;;  %v334_v30 = vpop.f32.mrf.mxu0 }
 0x1bb   :  { %2549 = vmatmul.mubr.msk.bf16.vlgmr.msra.gmra.mxu1 %vm1184_vm2, %v602_v45  ;;  %v605_v53 = vpack.i.b16 %v604_v46, %v603_v44  ;;  %v524_v58 = vcombine.high %v523_v26, %v2901_v34  ;;  %v896_v59 = vshrl.u32 %v878_v47, 16  ;;  %v591_v60 = vcombine.low %v582_v49, %v590_v51 }
 0x1bc   :  { %2559 = vmatpush3.bf16.xpose.msra.mxu1 %v1281_v52  ;;  %2560 = vmatprep.mubr.msk.bf16.mxu1 %vm2895_vm0, %v2894_v0  ;;  %v894_v61 = vpack.i.b16 %v878_v47, %v853_v50  ;;  %v610_v62 = vshrl.u32 %v549_v54, 16  ;;  %v895_v63 = vshrl.u32 %v853_v50, 16  ;;  %v566_v1 = vcombine.low %v557_v55, %v565_v56  ;;  %v2545_v32 = vpop.f32.mrf.mxu0 }
 0x1bd   :  { %2555 = vmatmul.mubr.msk.bf16.vlgmr.msra.gmra.mxu0 %vm1184_vm2, %v605_v53  ;;  %2570 = vmatprep.subr.bf16.mxu1 %v2894_v0  ;;  %v608_v2 = vpack.i.b16 %v549_v54, %v524_v58  ;;  %v609_v3 = vshrl.u32 %v524_v58, 16  ;;  %v879_v5 = vcombine.high %v878_v47, %v2901_v34  ;;  %v598_v8 = vrot.slane %v591_v60, %v3040_v43 }
 0x1be   :  { %2565 = vmatpush3.bf16.xpose.msra.mxu0 %v1327_v57  ;;  %2566 = vmatprep.mubr.msk.bf16.mxu0 %vm2895_vm0, %v2894_v0  ;;  %v897_v4 = vpack.i.b16 %v896_v59, %v895_v63  ;;  %v1373_v6 = vsel %vm1184_vm2, %v894_v61, 0  ;;  %v854_v9 = vcombine.high %v853_v50, %v2901_v34  ;;  %v573_v11 = vrot.slane %v566_v1, %v3040_v43 }
 0x1bf   :  { %2576 = vmatprep.subr.bf16.mxu0 %v2894_v0  ;;  %v611_v7 = vpack.i.b16 %v610_v62, %v609_v3  ;;  %v902_v12 = vshrl.u32 %v879_v5, 16  ;;  %v616_v14 = vshrl.u32 %v598_v8, 16  ;;  %v599_v21 = vcombine.high %v598_v8, %v2901_v34 }
 0x1c0   :  { %v1419_v10 = vsel %vm1184_vm2, %v897_v4, 0  ;;  %v900_v13 = vpack.i.b16 %v879_v5, %v854_v9  ;;  %v901_v15 = vshrl.u32 %v854_v9, 16  ;;  %v614_v16 = vpack.i.b16 %v598_v8, %v573_v11 }
 0x1c1   :  { %v615_v17 = vshrl.u32 %v573_v11, 16  ;;  %v574_v23 = vcombine.high %v573_v11, %v2901_v34  ;;  %v622_v24 = vshrl.u32 %v599_v21, 16  ;;  %v3156_v31 = vpack.c.bf16 %v334_v30, %v331_v28 }
 0x1c2   :  { %v903_v18 = vpack.i.b16 %v902_v12, %v901_v15  ;;  %v1465_v20 = vsel %vm1184_vm2, %v900_v13, 0 }
 0x1c3   :  { %2561 = vmatmul.mubr.msk.bf16.vlgmr.msra.gmra.mxu1 %vm1184_vm2, %v608_v2  ;;  %v617_v19 = vpack.i.b16 %v616_v14, %v615_v17  ;;  %v620_v25 = vpack.i.b16 %v599_v21, %v574_v23  ;;  %v621_v26 = vshrl.u32 %v574_v23, 16 }
 0x1c4   :  { %2571 = vmatpush3.bf16.xpose.msra.mxu1 %v1373_v6  ;;  %2572 = vmatprep.mubr.msk.bf16.mxu1 %vm2895_vm0, %v2894_v0  ;;  %v1511_v22 = vsel %vm1184_vm2, %v903_v18, 0 }
 0x1c5   :  { %2567 = vmatmul.mubr.msk.bf16.vlgmr.msra.gmra.mxu0 %vm1184_vm2, %v611_v7  ;;  %2582 = vmatprep.subr.bf16.mxu1 %v2894_v0  ;;  %v623_v27 = vpack.i.b16 %v622_v24, %v621_v26 }
 0x1c6   :  { %2577 = vmatpush3.bf16.xpose.msra.mxu0 %v1419_v10  ;;  %2578 = vmatprep.mubr.msk.bf16.mxu0 %vm2895_vm0, %v2894_v0 }
 0x1c7   :  { %2588 = vmatprep.subr.bf16.mxu0 %v2894_v0 }
 0x1cb   :  { %2573 = vmatmul.mubr.msk.bf16.vlgmr.msra.gmra.mxu1 %vm1184_vm2, %v614_v16 }
 0x1cc   :  { %2583 = vmatpush3.bf16.xpose.msra.mxu1 %v1465_v20  ;;  %2584 = vmatprep.mubr.msk.bf16.mxu1 %vm2895_vm0, %v2894_v0 }
 0x1cd   :  { %2579 = vmatmul.mubr.msk.bf16.vlgmr.msra.gmra.mxu0 %vm1184_vm2, %v617_v19  ;;  %2594 = vmatprep.subr.bf16.mxu1 %v2894_v0 }
 0x1ce   :  { %2589 = vmatpush3.bf16.xpose.msra.mxu0 %v1511_v22  ;;  %2590 = vmatprep.mubr.msk.bf16.mxu0 %vm2895_vm0, %v2894_v0 }
 0x1cf   :  { %2600 = vmatprep.subr.bf16.mxu0 %v2894_v0 }
 0x1d3   :  { %2585 = vmatmul.mubr.msk.bf16.vlgmr.msra.gmra.mxu1 %vm1184_vm2, %v620_v25 }
 0x1d4   :  { %2596 = vmatprep.mubr.msk.bf16.mxu1 %vm2895_vm0, %v2894_v0 }
 0x1d5   :  { %2591 = vmatmul.mubr.msk.bf16.vlgmr.msra.gmra.mxu0 %vm1184_vm2, %v623_v27 }
 0x1d6   :  { %2602 = vmatprep.mubr.msk.bf16.mxu0 %vm2895_vm0, %v2894_v0 }
 0x27b   :  { %v1225_v33 = vpop.f32.mrf.mxu1 }
 0x27c   :  { %v1553_v37 = vsel %vm1184_vm2, %v1225_v33, -inf }
 0x27d   :  { %1554 = vmax.xlane.f32.xlu0 %v1553_v37  ;;  %v2550_v38 = vpop.f32.mrf.mxu1  ;;  %v1271_v39 = vpop.f32.mrf.mxu0 }
 0x27e   :  { %v1556_v40 = vsel %vm1184_vm2, %v1271_v39, -inf }
 0x27f   :  { %v1228_v41 = vpop.f32.mrf.mxu1  ;;  %1557 = vmax.xlane.f32.xlu1 %v1556_v40  ;;  %v2556_v42 = vpop.f32.mrf.mxu0 }
 0x281   :  { %v2551_v44 = vpop.f32.mrf.mxu1  ;;  %v1274_v45 = vpop.f32.mrf.mxu0 }
 0x283   :  { %v2557_v46 = vpop.f32.mrf.mxu0  ;;  %v1317_v48 = vpop.f32.mrf.mxu1 }
 0x284   :  { %v1559_v47 = vsel %vm1184_vm2, %v1317_v48, -inf }
 0x285   :  { %1560 = vmax.xlane.f32.xlu0 %v1559_v47  ;;  %v2562_v49 = vpop.f32.mrf.mxu1  ;;  %v1363_v50 = vpop.f32.mrf.mxu0 }
 0x286   :  { %v1562_v53 = vsel %vm1184_vm2, %v1363_v50, -inf }
 0x287   :  { %v1320_v51 = vpop.f32.mrf.mxu1  ;;  %v2568_v52 = vpop.f32.mrf.mxu0 }
 0x289   :  { %v2563_v54 = vpop.f32.mrf.mxu1  ;;  %1563 = vmax.xlane.f32.xlu0 %v1562_v53  ;;  %v1366_v55 = vpop.f32.mrf.mxu0 }
 0x28b   :  { %v2569_v56 = vpop.f32.mrf.mxu0  ;;  %v1409_v57 = vpop.f32.mrf.mxu1 }
 0x28c   :  { %v1565_v58 = vsel %vm1184_vm2, %v1409_v57, -inf }
 0x28d   :  { %v2574_v59 = vpop.f32.mrf.mxu1  ;;  %1566 = vmax.xlane.f32.xlu1 %v1565_v58  ;;  %v1455_v60 = vpop.f32.mrf.mxu0 }
 0x28e   :  { %v1568_v61 = vsel %vm1184_vm2, %v1455_v60, -inf }
 0x28f   :  { %v1412_v62 = vpop.f32.mrf.mxu1  ;;  %1569 = vmax.xlane.f32.xlu0 %v1568_v61  ;;  %v2580_v63 = vpop.f32.mrf.mxu0 }
 0x291   :  { %v2575_v1 = vpop.f32.mrf.mxu1  ;;  %v1458_v2 = vpop.f32.mrf.mxu0 }
 0x292   :  { %v916_v2 = vshrl.u32 %v3156_v31, 16 }
 0x293   :  { %v2581_v3 = vpop.f32.mrf.mxu0  ;;  %v1501_v4 = vpop.f32.mrf.mxu1 }
 0x294   :  { %v1571_v5 = vsel %vm1184_vm2, %v1501_v4, -inf }
 0x295   :  { %v2586_v6 = vpop.f32.mrf.mxu1  ;;  %1572 = vmax.xlane.f32.xlu1 %v1571_v5  ;;  %v1547_v7 = vpop.f32.mrf.mxu0 }
 0x296   :  { %v1574_v8 = vsel %vm1184_vm2, %v1547_v7, -inf }
 0x297   :  { %v1504_v9 = vpop.f32.mrf.mxu1  ;;  %1575 = vmax.xlane.f32.xlu0 %v1574_v8  ;;  %v2592_v10 = vpop.f32.mrf.mxu0 }
 0x299   :  { %v2587_v11 = vpop.f32.mrf.mxu1  ;;  %v1550_v12 = vpop.f32.mrf.mxu0 }
 0x29b   :  { %v2593_v13 = vpop.f32.mrf.mxu0 }
 0x2a6   :  { %906 = vrot.lane.b32.xlu1 %v3156_v31, %s2897_s15 }
 0x306   :  { %v1555_v14 = vpop.xlane.xlu0 %1554 }
 0x307   :  { %v1577_v15 = vsub.f32 %v1225_v33, %v1555_v14 }
 0x308   :  { %v1558_v16 = vpop.xlane.xlu1 %1557 }
 0x309   :  { %v1585_v17 = vmul.f32 1.442695, %v1577_v15  ;;  %v1578_v18 = vsub.f32 %v1271_v39, %v1558_v16 }
 0x30b   :  { %2683 = vpow2.f32 %v1585_v17  ;;  %v1587_v20 = vmul.f32 1.442695, %v1578_v18 }
 0x30d   :  { %2685 = vpow2.f32 %v1587_v20 }
 0x30e   :  { %v1561_v24 = vpop.xlane.xlu0 %1560 }
 0x30f   :  { %v1579_v26 = vsub.f32 %v1317_v48, %v1561_v24 }
 0x311   :  { %v1589_v30 = vmul.f32 1.442695, %v1579_v26 }
 0x312   :  { %v1564_v25 = vpop.xlane.xlu0 %1563 }
 0x313   :  { %v1580_v28 = vsub.f32 %v1363_v50, %v1564_v25  ;;  %2687 = vpow2.f32 %v1589_v30 }
 0x315   :  { %v1591_v37 = vmul.f32 1.442695, %v1580_v28 }
 0x316   :  { %v1567_v29 = vpop.xlane.xlu1 %1566 }
 0x317   :  { %v1581_v38 = vsub.f32 %v1409_v57, %v1567_v29  ;;  %2689 = vpow2.f32 %v1591_v37 }
 0x318   :  { %v3168_v19 = vpop.eup %2683  ;;  %v1570_v27 = vpop.xlane.xlu0 %1569 }
 0x319   :  { %v1601_v21 = vsel %vm1184_vm2, %v3168_v19, 0.0  ;;  %v1582_v32 = vsub.f32 %v1455_v60, %v1570_v27  ;;  %v1593_v42 = vmul.f32 1.442695, %v1581_v38 }
 0x31a   :  { %v3172_v22 = vpop.eup %2685  ;;  %1602 = vadd.xlane.f32.xlu1 %v1601_v21 }
 0x31b   :  { %v1604_v23 = vsel %vm1184_vm2, %v3172_v22, 0.0  ;;  %v1595_v40 = vmul.f32 1.442695, %v1582_v32 }
 0x31c   :  { %1605 = vadd.xlane.f32.xlu0 %v1604_v23 }
 0x31d   :  { %2691 = vpow2.f32 %v1595_v40 }
 0x31e   :  { %v1573_v39 = vpop.xlane.xlu1 %1572  ;;  %2693 = vpow2.f32 %v1593_v42 }
 0x31f   :  { %v1583_v44 = vsub.f32 %v1501_v4, %v1573_v39 }
 0x320   :  { %v1576_v33 = vpop.xlane.xlu0 %1575  ;;  %v3180_v48 = vpop.eup %2687 }
 0x321   :  { %v1584_v41 = vsub.f32 %v1547_v7, %v1576_v33  ;;  %v1597_v46 = vmul.f32 1.442695, %v1583_v44  ;;  %v1607_v49 = vsel %vm1184_vm2, %v3180_v48, 0.0 }
 0x322   :  { %v907_v59 = vpop.permute.xlu1 %906 }
 0x323   :  { %v1599_v45 = vmul.f32 1.442695, %v1584_v41  ;;  %v917_v62 = vshrl.u32 %v907_v59, 16  ;;  %v3205_v1 = vpack.i.b16 %v907_v59, %v3156_v31 }
 0x324   :  { %v3182_v47 = vpop.eup %2689 }
 0x325   :  { %2695 = vpow2.f32 %v1599_v45  ;;  %v1610_v51 = vsel %vm1184_vm2, %v3182_v47, 0.0  ;;  %v3210_v7 = vpack.i.b16 %v917_v62, %v916_v2  ;;  %v935_v8 = vrot.slane %v3205_v1, %v3038_v36 }
 0x326   :  { %2697 = vpow2.f32 %v1597_v46 }
 0x327   :  { %v994_v2 = vcombine.high %v3210_v7, %v3036_v35 }
 0x32a   :  { %v3186_v50 = vpop.eup %2691 }
 0x32b   :  { %910 = vrot.lane.b32.xlu1 %v3156_v31, %s2896_s14  ;;  %v3190_v52 = vpop.eup %2693  ;;  %v1616_v53 = vsel %vm1184_vm2, %v3186_v50, 0.0 }
 0x32c   :  { %v1613_v55 = vsel %vm1184_vm2, %v3190_v52, 0.0 }
 0x332   :  { %908 = vrot.lane.b32.xlu0 %v3156_v31, %s2898_s22  ;;  %v3194_v54 = vpop.eup %2695  ;;  %v1001_v31 = vrot.slane %v3210_v7, %v3038_v36 }
 0x333   :  { %v3198_v56 = vpop.eup %2697  ;;  %v1622_v57 = vsel %vm1184_vm2, %v3194_v54, 0.0 }
 0x334   :  { %v1619_v58 = vsel %vm1184_vm2, %v3198_v56, 0.0 }
 0x34f   :  { %1608 = vadd.xlane.f32.xlu1 %v1607_v49 }
 0x351   :  { %1611 = vadd.xlane.f32.xlu0 %v1610_v51 }
 0x353   :  { %1617 = vadd.xlane.f32.xlu1 %v1616_v53 }
 0x355   :  { %1614 = vadd.xlane.f32.xlu0 %v1613_v55 }
 0x357   :  { %1623 = vadd.xlane.f32.xlu1 %v1622_v57 }
 0x359   :  { %1620 = vadd.xlane.f32.xlu0 %v1619_v58 }
 0x3a3   :  { %v1603_v60 = vpop.xlane.xlu1 %1602 }
 0x3a4   :  { %2699 = vrcp.f32 %v1603_v60 }
 0x3a5   :  { %v1606_v61 = vpop.xlane.xlu0 %1605 }
 0x3a6   :  { %2701 = vrcp.f32 %v1606_v61 }
 0x3a7   :  { %v911_v63 = vpop.permute.xlu1 %910 }
 0x3a8   :  { %v925_v4 = vshrl.u32 %v911_v63, 16 }
 0x3a9   :  { %v909_v3 = vpop.permute.xlu0 %908 }
 0x3aa   :  { %v3208_v5 = vpack.i.b16 %v911_v63, %v909_v3  ;;  %v924_v6 = vshrl.u32 %v909_v3, 16 }
 0x3ac   :  { %v3214_v9 = vpack.i.b16 %v925_v4, %v924_v6  ;;  %v950_v10 = vrot.slane %v3208_v5, %v3038_v36  ;;  %v943_v3 = vcombine.high %v3208_v5, %v3036_v35  ;;  %v928_v4 = vcombine.high %v3205_v1, %v3036_v35 }
 0x3ae   :  { %v958_v11 = vcombine.low %v935_v8, %v950_v10  ;;  %v959_v12 = vcombine.high %v935_v8, %v950_v10  ;;  %v1016_v13 = vrot.slane %v3214_v9, %v3038_v36  ;;  %v1008_v8 = vrot.slane %v994_v2, %v3038_v36 }
 0x3af   :  { %v942_v10 = vrot.slane %v928_v4, %v3038_v36 }
 0x3b0   :  { %v966_v14 = vrot.slane %v958_v11, %v3040_v43  ;;  %v973_v15 = vrot.slane %v959_v12, %v3040_v43  ;;  %v1024_v16 = vcombine.low %v1001_v31, %v1016_v13  ;;  %v1025_v17 = vcombine.high %v1001_v31, %v1016_v13 }
 0x3b1   :  { %v2700_v33 = vpop.eup %2699 }
 0x3b2   :  { %v1060_v18 = vcombine.low %v966_v14, %v973_v15  ;;  %v2454_v20 = vcombine.high %v966_v14, %v973_v15  ;;  %v1032_v21 = vrot.slane %v1024_v16, %v3040_v43  ;;  %v1039_v23 = vrot.slane %v1025_v17, %v3040_v43 }
 0x3b3   :  { %v2702_v39 = vpop.eup %2701  ;;  %v1633_v41 = vmul.f32 %v2700_v33, %v3168_v19 }
 0x3b4   :  { %v1067_v24 = vrot.slane %v1060_v18, %v3038_v36  ;;  %v1075_v25 = vrot.slane %v2454_v20, %v3038_v36  ;;  %v1085_v26 = vcombine.low %v1032_v21, %v1039_v23  ;;  %v2455_v27 = vcombine.high %v1032_v21, %v1039_v23 }
 0x3b5   :  { %v1634_v49 = vmul.f32 %v2702_v39, %v3172_v22  ;;  %v1641_v60 = vpack.c.bf16 %v1633_v41, %v1633_v41  ;;  %v1009_v22 = vcombine.high %v3214_v9, %v3036_v35  ;;  %v957_v9 = vrot.slane %v943_v3, %v3038_v36 }
 0x3b6   :  { %v1076_v28 = vcombine.low %v1067_v24, %v1075_v25  ;;  %v1092_v29 = vrot.slane %v1085_v26, %v3038_v36  ;;  %v1100_v30 = vrot.slane %v2455_v27, %v3038_v36 }
 0x3b7   :  { %v1642_v62 = vpack.c.bf16 %v1634_v49, %v1634_v49  ;;  %v1023_v6 = vrot.slane %v1009_v22, %v3038_v36  ;;  %v974_v31 = vcombine.low %v942_v10, %v957_v9  ;;  %v975_v7 = vcombine.high %v942_v10, %v957_v9 }
 0x3b8   :  { %v1083_v32 = vrot.slane %v1076_v28, %v3040_v43  ;;  %v1101_v37 = vcombine.low %v1092_v29, %v1100_v30 }
 0x3b9   :  { %v1040_v11 = vcombine.low %v1008_v8, %v1023_v6  ;;  %v1041_v12 = vcombine.high %v1008_v8, %v1023_v6  ;;  %v982_v14 = vrot.slane %v974_v31, %v3040_v43  ;;  %v989_v35 = vrot.slane %v975_v7, %v3040_v43 }
 0x3ba   :  { %v1084_v38 = vcombine.high %v1083_v32, %v2901_v34  ;;  %v1108_v40 = vrot.slane %v1101_v37, %v3040_v43  ;;  %v1163_v44 = vshrl.u32 %v1083_v32, 16 }
 0x3bb   :  { %v1048_v13 = vrot.slane %v1040_v11, %v3040_v43  ;;  %v1055_v5 = vrot.slane %v1041_v12, %v3040_v43  ;;  %v1110_v16 = vcombine.low %v982_v14, %v989_v35  ;;  %v2456_v17 = vcombine.high %v982_v14, %v989_v35  ;;  %v2681_v11 = vld [vmem:[#allocation13 + $0x8] sm:$0xff]  }
 0x3bc   :  { %v1162_v42 = vpack.i.b16 %v1108_v40, %v1083_v32  ;;  %v1164_v45 = vshrl.u32 %v1108_v40, 16  ;;  %v1109_v46 = vcombine.high %v1108_v40, %v2901_v34  ;;  %v1169_v51 = vshrl.u32 %v1084_v38, 16 }
 0x3bd   :  { %v1135_v1 = vcombine.low %v1048_v13, %v1055_v5  ;;  %v2457_v15 = vcombine.high %v1048_v13, %v1055_v5  ;;  %v1117_v24 = vrot.slane %v1110_v16, %v3038_v36  ;;  %v1125_v25 = vrot.slane %v2456_v17, %v3038_v36 }
 0x3be   :  { %v1654_v53 = vsel %vm1652_vm3, %v1162_v42, 0  ;;  %v1165_v55 = vpack.i.b16 %v1164_v45, %v1163_v44  ;;  %v1168_v57 = vpack.i.b16 %v1109_v46, %v1084_v38  ;;  %v1170_v58 = vshrl.u32 %v1109_v46, 16 }
 0x3bf   :  { %2595 = vmatpush3.bf16.msra.mxu1 %v1654_v53  ;;  %v1142_v20 = vrot.slane %v1135_v1, %v3038_v36  ;;  %v1150_v21 = vrot.slane %v2457_v15, %v3038_v36  ;;  %v1126_v29 = vcombine.low %v1117_v24, %v1125_v25 }
 0x3c0   :  { %v1700_v59 = vsel %vm1652_vm3, %v1165_v55, 0  ;;  %2606 = vmatprep.subr.bf16.mxu1 %v2894_v0  ;;  %v1171_v19 = vpack.i.b16 %v1170_v58, %v1169_v51  ;;  %v1746_v61 = vsel %vm1652_vm3, %v1168_v57, 0 }
 0x3c1   :  { %2601 = vmatpush3.bf16.msra.mxu0 %v1700_v59  ;;  %v1151_v27 = vcombine.low %v1142_v20, %v1150_v21  ;;  %v1133_v33 = vrot.slane %v1126_v29, %v3040_v43 }
 0x3c2   :  { %2597 = vmatmul.mubr.msk.bf16.vlgmr.msra.gmra.mxu1 %vm1184_vm2, %v1641_v60  ;;  %2612 = vmatprep.subr.bf16.mxu0 %v2894_v0  ;;  %v1792_v63 = vsel %vm1652_vm3, %v1171_v19, 0 }
 0x3c3   :  { %2607 = vmatpush3.bf16.msra.mxu1 %v1746_v61  ;;  %2608 = vmatprep.mubr.msk.bf16.mxu1 %vm2895_vm0, %v2894_v0  ;;  %v1158_v30 = vrot.slane %v1151_v27, %v3040_v43  ;;  %v1175_v42 = vshrl.u32 %v1133_v33, 16  ;;  %v1134_v58 = vcombine.high %v1133_v33, %v2901_v34 }
 0x3c4   :  { %2603 = vmatmul.mubr.msk.bf16.vlgmr.msra.gmra.mxu0 %vm1184_vm2, %v1642_v62  ;;  %2618 = vmatprep.subr.bf16.mxu1 %v2894_v0 }
 0x3c5   :  { %2613 = vmatpush3.bf16.msra.mxu0 %v1792_v63  ;;  %2614 = vmatprep.mubr.msk.bf16.mxu0 %vm2895_vm0, %v2894_v0  ;;  %v1176_v38 = vshrl.u32 %v1158_v30, 16  ;;  %v1174_v41 = vpack.i.b16 %v1158_v30, %v1133_v33  ;;  %v1159_v51 = vcombine.high %v1158_v30, %v2901_v34  ;;  %v1181_v62 = vshrl.u32 %v1134_v58, 16 }
 0x3c6   :  { %2624 = vmatprep.subr.bf16.mxu0 %v2894_v0 }
 0x3c7   :  { %v1177_v49 = vpack.i.b16 %v1176_v38, %v1175_v42  ;;  %v1838_v55 = vsel %vm1652_vm3, %v1174_v41, 0  ;;  %v1182_v60 = vshrl.u32 %v1159_v51, 16  ;;  %v1180_v19 = vpack.i.b16 %v1159_v51, %v1134_v58 }
 0x3c9   :  { %v1183_v63 = vpack.i.b16 %v1182_v60, %v1181_v62  ;;  %v1930_v3 = vsel %vm1652_vm3, %v1180_v19, 0 }
 0x3cb   :  { %v1976_v6 = vsel %vm1652_vm3, %v1183_v63, 0 }
 0x3d8   :  { %v1609_v18 = vpop.xlane.xlu1 %1608 }
 0x3d9   :  { %2703 = vrcp.f32 %v1609_v18 }
 0x3da   :  { %v1612_v23 = vpop.xlane.xlu0 %1611 }
 0x3db   :  { %2705 = vrcp.f32 %v1612_v23 }
 0x3dc   :  { %v1618_v26 = vpop.xlane.xlu1 %1617 }
 0x3dd   :  { %2707 = vrcp.f32 %v1618_v26 }
 0x3de   :  { %v1615_v28 = vpop.xlane.xlu0 %1614 }
 0x3df   :  { %2709 = vrcp.f32 %v1615_v28 }
 0x3e0   :  { %v1624_v37 = vpop.xlane.xlu1 %1623 }
 0x3e2   :  { %v1621_v32 = vpop.xlane.xlu0 %1620 }
 0x3e3   :  { %2711 = vrcp.f32 %v1621_v32 }
 0x3e4   :  { %2713 = vrcp.f32 %v1624_v37 }
 0x3e6   :  { %v2704_v39 = vpop.eup %2703 }
 0x3e7   :  { %v1635_v40 = vmul.f32 %v2704_v39, %v3180_v48  ;;  %v1884_v48 = vsel %vm1652_vm3, %v1177_v49, 0 }
 0x3e8   :  { %v2706_v44 = vpop.eup %2705 }
 0x3e9   :  { %v1643_v45 = vpack.c.bf16 %v1635_v40, %v1635_v40  ;;  %v1636_v46 = vmul.f32 %v2706_v44, %v3182_v47 }
 0x3ea   :  { %v2708_v53 = vpop.eup %2707 }
 0x3eb   :  { %2609 = vmatmul.mubr.msk.bf16.vlgmr.msra.gmra.mxu1 %vm1184_vm2, %v1643_v45  ;;  %v1644_v57 = vpack.c.bf16 %v1636_v46, %v1636_v46  ;;  %v1638_v61 = vmul.f32 %v2708_v53, %v3186_v50 }
 0x3ec   :  { %v2710_v59 = vpop.eup %2709  ;;  %2619 = vmatpush3.bf16.msra.mxu1 %v1838_v55  ;;  %2620 = vmatprep.mubr.msk.bf16.mxu1 %vm2895_vm0, %v2894_v0 }
 0x3ed   :  { %2615 = vmatmul.mubr.msk.bf16.vlgmr.msra.gmra.mxu0 %vm1184_vm2, %v1644_v57  ;;  %2630 = vmatprep.subr.bf16.mxu1 %v2894_v0  ;;  %v1637_v47 = vmul.f32 %v2710_v59, %v3190_v52  ;;  %v1646_v4 = vpack.c.bf16 %v1638_v61, %v1638_v61 }
 0x3ee   :  { %2625 = vmatpush3.bf16.msra.mxu0 %v1884_v48  ;;  %2626 = vmatprep.mubr.msk.bf16.mxu0 %vm2895_vm0, %v2894_v0 }
 0x3ef   :  { %2636 = vmatprep.subr.bf16.mxu0 %v2894_v0  ;;  %v1645_v22 = vpack.c.bf16 %v1637_v47, %v1637_v47 }
 0x3f0   :  { %v2712_v2 = vpop.eup %2711 }
 0x3f1   :  { %v2714_v52 = vpop.eup %2713  ;;  %v1639_v50 = vmul.f32 %v2712_v2, %v3198_v56 }
 0x3f2   :  { %v1640_v8 = vmul.f32 %v2714_v52, %v3194_v54 }
 0x3f3   :  { %2621 = vmatmul.mubr.msk.bf16.vlgmr.msra.gmra.mxu1 %vm1184_vm2, %v1645_v22  ;;  %v1647_v9 = vpack.c.bf16 %v1639_v50, %v1639_v50 }
 0x3f4   :  { %2631 = vmatpush3.bf16.msra.mxu1 %v1930_v3  ;;  %2632 = vmatprep.mubr.msk.bf16.mxu1 %vm2895_vm0, %v2894_v0  ;;  %v1648_v10 = vpack.c.bf16 %v1640_v8, %v1640_v8 }
 0x3f5   :  { %2627 = vmatmul.mubr.msk.bf16.vlgmr.msra.gmra.mxu0 %vm1184_vm2, %v1646_v4  ;;  %2642 = vmatprep.subr.bf16.mxu1 %v2894_v0 }
 0x3f6   :  { %2637 = vmatpush3.bf16.msra.mxu0 %v1976_v6  ;;  %2638 = vmatprep.mubr.msk.bf16.mxu0 %vm2895_vm0, %v2894_v0 }
 0x3fb   :  { %2633 = vmatmul.mubr.msk.bf16.vlgmr.msra.gmra.mxu1 %vm1184_vm2, %v1647_v9 }
 0x3fc   :  { %2646 = vmatprep.mubr.msk.bf16.mxu1 %vm2895_vm0, %v2894_v0  ;;  %2643 = vmatpush3.bf16.msra.mxu1 %v2681_v11 }
 0x3fd   :  { %2639 = vmatmul.mubr.msk.bf16.vlgmr.msra.gmra.mxu0 %vm1184_vm2, %v1648_v10  ;;  %2644 = vmatprep.subr.bf16.mxu1 %v2894_v0 }
 0x482   :  { %v1690_v56 = vpop.f32.mrf.mxu1 }
 0x483   :  { %v2018_v1 = vpack.c.bf16 %v1690_v56, %v1690_v56 }
 0x484   :  { %v2598_v12 = vpop.f32.mrf.mxu1  ;;  %v1736_v31 = vpop.f32.mrf.mxu0 }
 0x485   :  { %v2052_v15 = vpack.c.bf16 %v1736_v31, %v1736_v31  ;;  %v2025_v0 = vrot.slane %v2018_v1, %v3038_v36 }
 0x486   :  { %v1693_v7 = vpop.f32.mrf.mxu1  ;;  %v2604_v13 = vpop.f32.mrf.mxu0 }
 0x487   :  { %v2059_v25 = vrot.slane %v2052_v15, %v3038_v36 }
 0x488   :  { %v2599_v5 = vpop.f32.mrf.mxu1  ;;  %v1739_v54 = vpop.f32.mrf.mxu0 }
 0x48a   :  { %v2605_v14 = vpop.f32.mrf.mxu0 }
 0x4ab   :  { %v1782_v35 = vpop.f32.mrf.mxu1 }
 0x4ac   :  { %v2026_v16 = vpack.c.bf16 %v1782_v35, %v1782_v35 }
 0x4ad   :  { %v2610_v17 = vpop.f32.mrf.mxu1  ;;  %v1828_v18 = vpop.f32.mrf.mxu0 }
 0x4ae   :  { %v2033_v20 = vrot.slane %v2026_v16, %v3038_v36  ;;  %v2060_v21 = vpack.c.bf16 %v1828_v18, %v1828_v18 }
 0x4af   :  { %v1785_v23 = vpop.f32.mrf.mxu1  ;;  %v2616_v24 = vpop.f32.mrf.mxu0 }
 0x4b0   :  { %v2067_v26 = vrot.slane %v2060_v21, %v3038_v36  ;;  %v2034_v29 = vcombine.low %v2025_v0, %v2033_v20  ;;  %v2035_v33 = vcombine.high %v2025_v0, %v2033_v20 }
 0x4b1   :  { %v2611_v27 = vpop.f32.mrf.mxu1  ;;  %v1831_v28 = vpop.f32.mrf.mxu0 }
 0x4b2   :  { %v2068_v30 = vcombine.low %v2059_v25, %v2067_v26  ;;  %v2069_v32 = vcombine.high %v2059_v25, %v2067_v26  ;;  %v2042_v44 = vrot.slane %v2034_v29, %v3040_v43  ;;  %v2049_v45 = vrot.slane %v2035_v33, %v3040_v43 }
 0x4b3   :  { %v2617_v37 = vpop.f32.mrf.mxu0  ;;  %v1874_v38 = vpop.f32.mrf.mxu1 }
 0x4b4   :  { %v2076_v39 = vrot.slane %v2068_v30, %v3040_v43  ;;  %v2083_v40 = vrot.slane %v2069_v32, %v3040_v43  ;;  %v2050_v58 = vcombine.high %v2042_v44, %v2901_v34  ;;  %v2086_v59 = vpack.c.bf16 %v1874_v38, %v1874_v38 }
 0x4b5   :  { %v2622_v41 = vpop.f32.mrf.mxu1  ;;  %v1920_v42 = vpop.f32.mrf.mxu0  ;;  %v2051_v48 = vcombine.high %v2049_v45, %v2901_v34  ;;  %v2158_v47 = vshrl.u32 %v2042_v44, 16  ;;  %v2174_v62 = vshrl.u32 %v2049_v45, 16 }
 0x4b6   :  { %v2084_v51 = vcombine.high %v2076_v39, %v2901_v34  ;;  %v2085_v53 = vcombine.high %v2083_v40, %v2901_v34  ;;  %v2120_v60 = vpack.c.bf16 %v1920_v42, %v1920_v42  ;;  %v2159_v22 = vshrl.u32 %v2076_v39, 16 }
 0x4b7   :  { %v1877_v46 = vpop.f32.mrf.mxu1  ;;  %v2628_v49 = vpop.f32.mrf.mxu0  ;;  %v2175_v63 = vshrl.u32 %v2083_v40, 16  ;;  %v2166_v9 = vshrl.u32 %v2050_v58, 16  ;;  %v2093_v10 = vrot.slane %v2086_v59, %v3038_v36  ;;  %v2182_v12 = vshrl.u32 %v2051_v48, 16 }
 0x4b8   :  { %v2164_v3 = vpack.i.b16 %v2084_v51, %v2050_v58  ;;  %v2167_v4 = vshrl.u32 %v2084_v51, 16  ;;  %v2180_v52 = vpack.i.b16 %v2085_v53, %v2051_v48  ;;  %v2183_v6 = vshrl.u32 %v2085_v53, 16 }
 0x4b9   :  { %v2623_v55 = vpop.f32.mrf.mxu1  ;;  %v1923_v57 = vpop.f32.mrf.mxu0  ;;  %v2156_v31 = vpack.i.b16 %v2076_v39, %v2042_v44  ;;  %v2172_v7 = vpack.i.b16 %v2083_v40, %v2049_v45  ;;  %v2127_v13 = vrot.slane %v2120_v60, %v3038_v36  ;;  %v2160_v14 = vpack.i.b16 %v2159_v22, %v2158_v47 }
 0x4ba   :  { %v2168_v16 = vpack.i.b16 %v2167_v4, %v2166_v9  ;;  %v2176_v17 = vpack.i.b16 %v2175_v63, %v2174_v62  ;;  %v2184_v18 = vpack.i.b16 %v2183_v6, %v2182_v12  ;;  %v2226_v23 = vcombine.low %v2164_v3, %v2180_v52  ;;  %v2682_v9 = vld [vmem:[#allocation13] sm:$0xff]  }
 0x4bb   :  { %v2629_v19 = vpop.f32.mrf.mxu0  ;;  %v1966_v61 = vpop.f32.mrf.mxu1  ;;  %v2218_v29 = vcombine.low %v2156_v31, %v2172_v7  ;;  %2645 = vmatpush3.bf16.msra.mxu1 %v2682_v9 }
 0x4bc   :  { %v2094_v2 = vpack.c.bf16 %v1966_v61, %v1966_v61  ;;  %v2268_v33 = vcombine.low %v2160_v14, %v2176_v17  ;;  %v2233_v39 = vrot.slane %v2226_v23, %v3038_v36  ;;  %v2276_v40 = vcombine.low %v2168_v16, %v2184_v18 }
 0x4bd   :  { %v2634_v50 = vpop.f32.mrf.mxu1  ;;  %v2012_v8 = vpop.f32.mrf.mxu0  ;;  %v2225_v62 = vrot.slane %v2218_v29, %v3038_v36 }
 0x4be   :  { %v2101_v11 = vrot.slane %v2094_v2, %v3038_v36  ;;  %v2128_v56 = vpack.c.bf16 %v2012_v8, %v2012_v8  ;;  %v2275_v6 = vrot.slane %v2268_v33, %v3038_v36 }
 0x4bf   :  { %v1969_v5 = vpop.f32.mrf.mxu1  ;;  %v2640_v54 = vpop.f32.mrf.mxu0  ;;  %v2250_v52 = vcombine.low %v2225_v62, %v2233_v39 }
 0x4c0   :  { %v2102_v35 = vcombine.low %v2093_v10, %v2101_v11  ;;  %v2103_v1 = vcombine.high %v2093_v10, %v2101_v11  ;;  %v2135_v15 = vrot.slane %v2128_v56, %v3038_v36 }
 0x4c1   :  { %v2635_v20 = vpop.f32.mrf.mxu1  ;;  %v2015_v21 = vpop.f32.mrf.mxu0  ;;  %v2257_v12 = vrot.slane %v2250_v52, %v3040_v43 }
 0x4c2   :  { %v2110_v24 = vrot.slane %v2102_v35, %v3040_v43  ;;  %v2117_v0 = vrot.slane %v2103_v1, %v3040_v43  ;;  %v2136_v25 = vcombine.low %v2127_v13, %v2135_v15  ;;  %v2137_v26 = vcombine.high %v2127_v13, %v2135_v15 }
 0x4c3   :  { %v2641_v27 = vpop.f32.mrf.mxu0 }
 0x4c4   :  { %v2118_v28 = vcombine.high %v2110_v24, %v2901_v34  ;;  %v2144_v30 = vrot.slane %v2136_v25, %v3040_v43  ;;  %v2151_v32 = vrot.slane %v2137_v26, %v3040_v43  ;;  %v2119_v37 = vcombine.high %v2117_v0, %v2901_v34 }
 0x4c5   :  { %v2190_v38 = vshrl.u32 %v2110_v24, 16  ;;  %v2206_v49 = vshrl.u32 %v2117_v0, 16 }
 0x4c6   :  { %v2152_v41 = vcombine.high %v2144_v30, %v2901_v34  ;;  %v2153_v42 = vcombine.high %v2151_v32, %v2901_v34  ;;  %v2188_v44 = vpack.i.b16 %v2144_v30, %v2110_v24  ;;  %v2191_v45 = vshrl.u32 %v2144_v30, 16 }
 0x4c7   :  { %v2198_v46 = vshrl.u32 %v2118_v28, 16  ;;  %v2204_v51 = vpack.i.b16 %v2151_v32, %v2117_v0  ;;  %v2207_v53 = vshrl.u32 %v2151_v32, 16  ;;  %v2214_v48 = vshrl.u32 %v2119_v37, 16 }
 0x4c8   :  { %v2192_v55 = vpack.i.b16 %v2191_v45, %v2190_v38  ;;  %v2196_v57 = vpack.i.b16 %v2152_v41, %v2118_v28  ;;  %v2199_v58 = vshrl.u32 %v2152_v41, 16  ;;  %v2212_v59 = vpack.i.b16 %v2153_v42, %v2119_v37  ;;  %v2474_v28 = vld [vmem:[%s3360_s8] ss:$0 sm:$0xff] }
 0x4c9   :  { %v2208_v47 = vpack.i.b16 %v2207_v53, %v2206_v49  ;;  %v2215_v60 = vshrl.u32 %v2153_v42, 16  ;;  %v2234_v19 = vcombine.low %v2188_v44, %v2204_v51  ;;  %v2283_v34 = vrot.slane %v2276_v40, %v3038_v36 }
 0x4ca   :  { %v2200_v61 = vpack.i.b16 %v2199_v58, %v2198_v46  ;;  %v2242_v22 = vcombine.low %v2196_v57, %v2212_v59 }
 0x4cb   :  { %v2216_v63 = vpack.i.b16 %v2215_v60, %v2214_v48  ;;  %v2284_v2 = vcombine.low %v2192_v55, %v2208_v47  ;;  %v2241_v3 = vrot.slane %v2234_v19, %v3038_v36  ;;  %v2300_v56 = vcombine.low %v2275_v6, %v2283_v34 }
 0x4cc   :  { %v2249_v4 = vrot.slane %v2242_v22, %v3038_v36 }
 0x4cd   :  { %v2292_v50 = vcombine.low %v2200_v61, %v2216_v63  ;;  %v2291_v10 = vrot.slane %v2284_v2, %v3038_v36  ;;  %v2307_v5 = vrot.slane %v2300_v56, %v3040_v43 }
 0x4ce   :  { %v2258_v8 = vcombine.low %v2241_v3, %v2249_v4 }
 0x4cf   :  { %v2299_v11 = vrot.slane %v2292_v50, %v3038_v36 }
 0x4d0   :  { %v2265_v31 = vrot.slane %v2258_v8, %v3040_v43 }
 0x4d1   :  { %v2308_v7 = vcombine.low %v2291_v10, %v2299_v11 }
 0x4d2   :  { %v2266_v13 = vcombine.low %v2257_v12, %v2265_v31  ;;  %v2267_v14 = vcombine.high %v2257_v12, %v2265_v31 }
 0x4d3   :  { %v2315_v54 = vrot.slane %v2308_v7, %v3040_v43 }
 0x4d4   :  { %v2321_v15 = vshrl.u32 %v2266_v13, 16  ;;  %v2327_v21 = vshrl.u32 %v2267_v14, 16 }
 0x4d5   :  { %v2317_v35 = vcombine.high %v2307_v5, %v2315_v54  ;;  %v2316_v1 = vcombine.low %v2307_v5, %v2315_v54 }
 0x4d7   :  { %v2326_v16 = vpack.i.b16 %v2317_v35, %v2267_v14  ;;  %v2322_v17 = vshrl.u32 %v2316_v1, 16  ;;  %v2328_v18 = vshrl.u32 %v2317_v35, 16  ;;  %v2320_v36 = vpack.i.b16 %v2316_v1, %v2266_v13 }
 0x4d9   :  { %2332 = vrot.lane.b32.xlu1 %v2326_v16, %s2902_s4  ;;  %v2323_v20 = vpack.i.b16 %v2322_v17, %v2321_v15  ;;  %v2329_v23 = vpack.i.b16 %v2328_v18, %v2327_v21 }
 0x4db   :  { %2330 = vrot.lane.b32.xlu0 %v2323_v20, %s2903_s23 }
 0x4dd   :  { %2334 = vrot.lane.b32.xlu1 %v2329_v23, %s2904_s24 }
 0x54b   :  { %v2333_v24 = vpop.permute.xlu1 %2332 }
 0x54d   :  { %v2331_v43 = vpop.permute.xlu0 %2330 }
 0x54e   :  { %v2338_v0 = vsel %vm1184_vm2, %v2320_v36, %v2331_v43 }
 0x54f   :  { %v2335_v25 = vpop.permute.xlu1 %2334  ;;  %v2341_v26 = vsel %vm2339_vm4, %v2338_v0, %v2333_v24 }
 0x550   :  { %v2344_v27 = vsel %vm2342_vm5, %v2341_v26, %v2335_v25 }
 0x551   :  { %2647 = vmatmul.mubr.msk.bf16.vlgmr.msra.gmra.mxu1 %vm163_vm1, %v2344_v27 }
 0x611   :  { %v2404_v29 = vpop.f32.mrf.mxu1 }
 0x612   :  { %v2405_v30 = vadd.f32 %v2474_v28, %v2404_v29 }
 0x613   :  { %v2648_v32 = vpop.f32.mrf.mxu1 }
 0x614   :  { %2411 = vst.msk [vmem:[#allocation14] sm:$0xff] %vm163_vm1, %v2405_v30 }
 0x615   :  { %v2407_v33 = vpop.f32.mrf.mxu1 }
 0x616   :  { %v2408_v37 = vadd.f32 %v2474_v28, %v2407_v33 }
 0x617   :  { %v2649_v38 = vpop.f32.mrf.mxu1 }
 0x618   :  { %2412 = vst.msk [vmem:[#allocation14 + $0x8] sm:$0xff] %vm163_vm1, %v2408_v37 }
 0x619   :  { %2866 = shalt.err (!%p2863_p11)
}
 0x61a   :  { %s2906_s8 = smov 128  }
 0x61b   :  { %2424 = dma.vmem_to_hbm [thread:$0]  %s2419_s3, 256, %s3361_s9, [#allocation4], %s2906_s8, %s2906_s8, %s2903_s23  }
 0x61c   :  { %2883 = dma.done.wait [#allocation4], 256  }
 0x61d   :  { %2884 = vsyncadd [#allocation4], 4294967040 }
 0x61e   :  { %2428 = vsyncpa [#allocation3], 1 }
 0x61f   :  { %2429 = vsyncpa [#allocation6], 1 }
 0x620   :  { %2430 = vsyncpa [#allocation9], 1 }
 0x621   :  { %2431 = vsyncpa [#allocation12], 1 }
 0x622   :  { %2432 = vsyncpa [#allocation4], 1 }

</bundles_post_ra>
